<compile_context>
chip_gen: v5e
topology: v5e:2x2
jax: 0.10.0
libtpu: 0.0.40
codegen_flags: <defaults>
</compile_context>

<pallas_src>
import jax
import jax.numpy as jnp
from jax.experimental import pallas as pl
from jax.experimental.pallas import tpu as pltpu


def _reg_l1_kernel(ind_ref, mask_ref, target_ref, feat_ref, num_ref, acc_ref):
    # ind_ref:    VMEM (1, 1, K) int32   gather indices for this batch
    # mask_ref:   VMEM (1, 1, K) f32     per-keypoint mask (K on lanes)
    # target_ref: VMEM (1, C, K) src-dt  per-batch target, lane-dense
    # feat_ref:   VMEM (1, C, T) src-dt  streamed feature slab (T on lanes)
    # num_ref:    VMEM (1, 1, 1) f32     per-batch sum |pred*m - tgt*m|
    # acc_ref:    VMEM (C, K) f32        gathered-pred accumulator across tiles
    t = pl.program_id(1)
    n_t = pl.num_programs(1)

    @pl.when(t == 0)
    def _():
        acc_ref[...] = jnp.zeros_like(acc_ref)

    C, T = feat_ref.shape[1], feat_ref.shape[2]
    K = ind_ref.shape[2]

    feat = feat_ref[0]                                   # (C, T), source dtype
    idx = ind_ref[0]                                     # (1, K) int32

    # One-hot selection matrix for this HW tile; out-of-tile indices match no row.
    rows = jax.lax.broadcasted_iota(jnp.int32, (T, K), 0) + t * T
    onehot = (rows == idx).astype(feat.dtype)            # (T, K)

    # MXU gather: exactly one nonzero per column -> exact selection, f32 accum.
    acc_ref[...] += jnp.dot(feat, onehot, preferred_element_type=jnp.float32)

    @pl.when(t == n_t - 1)
    def _():
        pred = acc_ref[...]                              # (C, K) f32
        tgt = target_ref[0].astype(jnp.float32)          # (C, K)
        m = mask_ref[0]                                  # (1, K), broadcasts over C
        diff = jnp.abs(pred * m - tgt * m)               # one lane-dense VPU pass
        num_ref[...] = jnp.sum(diff, keepdims=True).reshape(1, 1, 1)


def _pick_hw_tile(hw, cap=512):
    """Largest multiple of 128 that divides hw (capped); else the whole extent."""
    if hw <= 128 or hw % 128 != 0:
        return hw
    best = 128
    t = 128
    while t <= min(hw, cap):
        if hw % t == 0:
            best = t
        t += 128
    return best


def reg_l1_loss(output, mask, ind, target):
    """output: (B,C,H,W); mask: (B,K); ind: (B,K) int; target: (B,K,C) -> scalar."""
    B, C, H, W = output.shape
    K = ind.shape[1]
    HW = H * W

    feat = output.reshape(B, C, HW)                        # free view, source dtype
    ind3 = ind.astype(jnp.int32).reshape(B, 1, K)          # tiny
    mask3 = mask.astype(jnp.float32).reshape(B, 1, K)      # tiny
    target_t = jnp.transpose(target, (0, 2, 1))            # (B, C, K), tiny

    T = _pick_hw_tile(HW)
    grid = (B, HW // T)

    num = pl.pallas_call(
        _reg_l1_kernel,
        out_shape=jax.ShapeDtypeStruct((B, 1, 1), jnp.float32),  # per-batch partials
        grid=grid,
        in_specs=[
            pl.BlockSpec((1, 1, K), lambda b, t: (b, 0, 0)),     # ind
            pl.BlockSpec((1, 1, K), lambda b, t: (b, 0, 0)),     # mask
            pl.BlockSpec((1, C, K), lambda b, t: (b, 0, 0)),     # target (B,C,K)
            pl.BlockSpec((1, C, T), lambda b, t: (b, 0, t)),     # feat slab, streamed
        ],
        out_specs=pl.BlockSpec((1, 1, 1), lambda b, t: (b, 0, 0)),
        scratch_shapes=[pltpu.VMEM((C, K), jnp.float32)],
        compiler_params=pltpu.CompilerParams(
            dimension_semantics=("parallel", "arbitrary")),
    )(ind3, mask3, target_t, feat)

    # Denominator needs only `mask`: expanded mask sums to C * sum(mask).
    den = jnp.sum(mask.astype(jnp.float32)) * jnp.float32(C)
    return jnp.sum(num) / (den + 0.0001)


def _reference(output, mask, ind, target):
    B, C, H, W = output.shape
    feat = jnp.transpose(output, (0, 2, 3, 1)).reshape(B, H * W, C)
    pred = jnp.take_along_axis(
        feat, ind[:, :, None].astype(jnp.int32), axis=1).astype(jnp.float32)
    m = jnp.broadcast_to(mask[:, :, None].astype(jnp.float32), pred.shape)
    loss = jnp.sum(jnp.abs(pred * m - target.astype(jnp.float32) * m))
    return loss / (jnp.sum(m) + 0.0001)


if __name__ == "__main__":
    root = jax.random.PRNGKey(0)

    def _run_case(key, B, C, H, W, K, dtype):
        k1, k2, k3, k4 = jax.random.split(key, 4)
        output = jax.random.normal(k1, (B, C, H, W), dtype=jnp.float32).astype(dtype)
        ind = jax.random.randint(k2, (B, K), 0, H * W, dtype=jnp.int32)
        mask = (jax.random.uniform(k3, (B, K)) > 0.3).astype(jnp.float32)
        target = jax.random.normal(k4, (B, K, C), dtype=jnp.float32).astype(dtype)

        loss = jax.jit(reg_l1_loss)(output, mask, ind, target)
        jax.block_until_ready(loss)
        ref = _reference(output, mask, ind, target)
        assert jnp.allclose(loss, ref, atol=1e-4, rtol=1e-4), (loss, ref)

    ka, kb = jax.random.split(root)
    # Base shape (single HW tile, f32 features).
    _run_case(ka, B=2, C=4, H=16, W=16, K=8, dtype=jnp.float32)
    # Multi-tile accumulation path + bf16 source dtype kept end-to-end.
    _run_case(kb, B=2, C=3, H=32, W=32, K=16, dtype=jnp.bfloat16)

    print("KERNEL_OK")
</pallas_src>

<mosaic_0001>
module attributes {stable_mosaic.version = 11 : i64} {
  func.func @_reg_l1_kernel(%arg0: i32, %arg1: i32, %arg2: memref<1x1x8xi32, #tpu.memory_space<vmem>>, %arg3: memref<1x1x8xf32, #tpu.memory_space<vmem>>, %arg4: memref<1x4x8xf32, #tpu.memory_space<vmem>>, %arg5: memref<1x4x256xf32, #tpu.memory_space<vmem>>, %arg6: memref<1x1x1xf32, #tpu.memory_space<vmem>>, %arg7: memref<4x8xf32, #tpu.memory_space<vmem>>) attributes {dimension_semantics = [#tpu.dimension_semantics<parallel>, #tpu.dimension_semantics<arbitrary>], iteration_bounds = array<i64: 2, 1>, scalar_prefetch = 0 : i64, scratch_operands = 1 : i64, tpu.core_type = #tpu.core_type<tc>, window_params = [{transform_indices = @transform_0, window_bounds = array<i64: 1, 1, 8>}, {transform_indices = @transform_1, window_bounds = array<i64: 1, 1, 8>}, {transform_indices = @transform_2, window_bounds = array<i64: 1, 4, 8>}, {transform_indices = @transform_3, window_bounds = array<i64: 1, 4, 256>}, {transform_indices = @transform_4, window_bounds = array<i64: 1, 1, 1>}]} {
    %c0_i32 = arith.constant 0 : i32
    %0 = arith.cmpi eq, %arg1, %c0_i32 : i32
    %1 = arith.extui %0 : i1 to i32
    %c0_i32_0 = arith.constant 0 : i32
    %2 = arith.cmpi ne, %1, %c0_i32_0 : i32
    scf.if %2 {
      %cst_12 = arith.constant 0.000000e+00 : f32
      %22 = vector.broadcast %cst_12 : f32 to vector<4x8xf32>
      %c0_13 = arith.constant 0 : index
      %c0_14 = arith.constant 0 : index
      %23 = vector.load %arg7[%c0_13, %c0_14] : memref<4x8xf32, #tpu.memory_space<vmem>>, vector<4x8xf32>
      tpu.vector_store %arg7[%c0_13, %c0_14], %22 {strides = array<i32>} : memref<4x8xf32, #tpu.memory_space<vmem>>, vector<4x8xf32>,
    } else {
    }
    %c0 = arith.constant 0 : index
    %c0_1 = arith.constant 0 : index
    %c0_2 = arith.constant 0 : index
    %3 = vector.load %arg5[%c0, %c0_1, %c0_2] : memref<1x4x256xf32, #tpu.memory_space<vmem>>, vector<1x4x256xf32>
    %4 = vector.shape_cast %3 : vector<1x4x256xf32> to vector<4x256xf32>
    %c0_3 = arith.constant 0 : index
    %c0_4 = arith.constant 0 : index
    %c0_5 = arith.constant 0 : index
    %5 = vector.load %arg2[%c0_3, %c0_4, %c0_5] : memref<1x1x8xi32, #tpu.memory_space<vmem>>, vector<1x1x8xi32>
    %6 = vector.shape_cast %5 : vector<1x1x8xi32> to vector<1x8xi32>
    %7 = tpu.iota {dimensions = array<i32: 0>} : vector<256x8xi32>
    %c256_i32 = arith.constant 256 : i32
    %8 = arith.muli %arg1, %c256_i32 : i32
    %9 = vector.broadcast %8 : i32 to vector<256x8xi32>
    %10 = arith.addi %7, %9 : vector<256x8xi32>
    %11 = vector.broadcast %6 : vector<1x8xi32> to vector<256x8xi32>
    %12 = arith.cmpi eq, %10, %11 : vector<256x8xi32>
    %13 = arith.extui %12 : vector<256x8xi1> to vector<256x8xi32>
    %14 = arith.sitofp %13 : vector<256x8xi32> to vector<256x8xf32>
    %c0_6 = arith.constant 0 : index
    %c0_7 = arith.constant 0 : index
    %15 = vector.load %arg7[%c0_6, %c0_7] : memref<4x8xf32, #tpu.memory_space<vmem>>, vector<4x8xf32>
    %cst = arith.constant dense<0.000000e+00> : vector<4x8xf32>
    %16 = tpu.matmul %4, %14, %cst {dimension_numbers = #tpu.dot_dimension_numbers<[1], [0], [0], [1], [0, 0, 1, 1], [], []>} : vector<4x256xf32>, vector<256x8xf32>, vector<4x8xf32> -> vector<4x8xf32>
    %17 = arith.addf %15, %16 : vector<4x8xf32>
    %c0_8 = arith.constant 0 : index
    %c0_9 = arith.constant 0 : index
    %18 = vector.load %arg7[%c0_8, %c0_9] : memref<4x8xf32, #tpu.memory_space<vmem>>, vector<4x8xf32>
    tpu.vector_store %arg7[%c0_8, %c0_9], %17 {strides = array<i32>} : memref<4x8xf32, #tpu.memory_space<vmem>>, vector<4x8xf32>,
    %c0_i32_10 = arith.constant 0 : i32
    %19 = arith.cmpi eq, %arg1, %c0_i32_10 : i32
    %20 = arith.extui %19 : i1 to i32
    %c0_i32_11 = arith.constant 0 : i32
    %21 = arith.cmpi ne, %20, %c0_i32_11 : i32
    scf.if %21 {
      %c0_12 = arith.constant 0 : index
      %c0_13 = arith.constant 0 : index
      %22 = vector.load %arg7[%c0_12, %c0_13] : memref<4x8xf32, #tpu.memory_space<vmem>>, vector<4x8xf32>
      %c0_14 = arith.constant 0 : index
      %c0_15 = arith.constant 0 : index
      %c0_16 = arith.constant 0 : index
      %23 = vector.load %arg4[%c0_14, %c0_15, %c0_16] : memref<1x4x8xf32, #tpu.memory_space<vmem>>, vector<1x4x8xf32>
      %24 = vector.shape_cast %23 : vector<1x4x8xf32> to vector<4x8xf32>
      %c0_17 = arith.constant 0 : index
      %c0_18 = arith.constant 0 : index
      %c0_19 = arith.constant 0 : index
      %25 = vector.load %arg3[%c0_17, %c0_18, %c0_19] : memref<1x1x8xf32, #tpu.memory_space<vmem>>, vector<1x1x8xf32>
      %26 = vector.shape_cast %25 : vector<1x1x8xf32> to vector<1x8xf32>
      %27 = vector.broadcast %26 : vector<1x8xf32> to vector<4x8xf32>
      %28 = arith.mulf %22, %27 : vector<4x8xf32>
      %29 = vector.broadcast %26 : vector<1x8xf32> to vector<4x8xf32>
      %30 = arith.mulf %24, %29 : vector<4x8xf32>
      %31 = arith.subf %28, %30 : vector<4x8xf32>
      %32 = math.absf %31 : vector<4x8xf32>
      %33 = vector.shape_cast %32 : vector<4x8xf32> to vector<1x4x8xf32>
      %cst_20 = arith.constant dense<0.000000e+00> : vector<1xf32>
      %34 = vector.multi_reduction <add>, %33, %cst_20 [1, 2] : vector<1x4x8xf32> to vector<1xf32>
      %35 = vector.shape_cast %34 : vector<1xf32> to vector<1x1x1xf32>
      %36 = vector.extract %35[0, 0, 0] : f32 from vector<1x1x1xf32>
      %37 = vector.broadcast %36 : f32 to vector<1x1xf32>
      %38 = vector.shape_cast %37 : vector<1x1xf32> to vector<1x1x1xf32>
      %c0_21 = arith.constant 0 : index
      %c0_22 = arith.constant 0 : index
      %c0_23 = arith.constant 0 : index
      %39 = vector.load %arg6[%c0_21, %c0_22, %c0_23] : memref<1x1x1xf32, #tpu.memory_space<vmem>>, vector<1x1x1xf32>
      tpu.vector_store %arg6[%c0_21, %c0_22, %c0_23], %38 {strides = array<i32>} : memref<1x1x1xf32, #tpu.memory_space<vmem>>, vector<1x1x1xf32>,
    } else {
    }
    return
  }
  func.func @transform_0(%arg0: i32, %arg1: i32) -> (i32, i32, i32) {
    %c0_i32 = arith.constant 0 : i32
    %c0_i32_0 = arith.constant 0 : i32
    %c0_i32_1 = arith.constant 0 : i32
    return %arg0, %c0_i32, %c0_i32_0 : i32, i32, i32
  }
  func.func @transform_1(%arg0: i32, %arg1: i32) -> (i32, i32, i32) {
    %c0_i32 = arith.constant 0 : i32
    %c0_i32_0 = arith.constant 0 : i32
    %c0_i32_1 = arith.constant 0 : i32
    return %arg0, %c0_i32, %c0_i32_0 : i32, i32, i32
  }
  func.func @transform_2(%arg0: i32, %arg1: i32) -> (i32, i32, i32) {
    %c0_i32 = arith.constant 0 : i32
    %c0_i32_0 = arith.constant 0 : i32
    %c0_i32_1 = arith.constant 0 : i32
    return %arg0, %c0_i32, %c0_i32_0 : i32, i32, i32
  }
  func.func @transform_3(%arg0: i32, %arg1: i32) -> (i32, i32, i32) {
    %c0_i32 = arith.constant 0 : i32
    %c0_i32_0 = arith.constant 0 : i32
    return %arg0, %c0_i32, %arg1 : i32, i32, i32
  }
  func.func @transform_4(%arg0: i32, %arg1: i32) -> (i32, i32, i32) {
    %c0_i32 = arith.constant 0 : i32
    %c0_i32_0 = arith.constant 0 : i32
    %c0_i32_1 = arith.constant 0 : i32
    return %arg0, %c0_i32, %c0_i32_0 : i32, i32, i32
  }
}

</mosaic_0001>

<bundles_post_ra>
// kernel: reg_l1_loss.1
= control target key start
LH: loop header
LB: loop body
LE: loop exit
PB: predicated region body
PF: predicated region fallthrough
CT: control target
= control target key end

     0   :  { %s762_s15 = smov 0   ;;  %s764_s16 = smov 0   ;;  %s914_s0 = inlined_call_operand.vmem [shape: s32[2,1,8], index: 0, kind: input, shape index: {}]   ;;  %s915_s1 = inlined_call_operand.vmem [shape: f32[2,1,8], index: 1, kind: input, shape index: {}]   ;;  %s916_s2 = inlined_call_operand.vmem [shape: f32[2,4,8], index: 2, kind: input, shape index: {}]   ;;  %s917_s3 = inlined_call_operand.vmem [shape: f32[2,4,256], index: 3, kind: input, shape index: {}]   ;;  %s918_s4 = inlined_call_operand.vmem [shape: f32[2,1,1], index: 4, kind: output, shape index: {}]  }
   0x1   :  { %s766_s17 = smov 0  }
   0x2 LB: > { %s26_s18 = sadd.s32 1, %s729_s16  ;;  %p610_p0 = scmp.ge.s32.totalorder %s733_s17, 1  ;;  %s733_s17 = sphi %s766_s17, %s14_s17   ;;  %s729_s16 = sphi %s764_s16, %s920_s16   ;;  %s725_s15 = sphi %s762_s15, %s919_s15  }
   0x3   : > { %p28_p1 = scmp.ge.s32.totalorder %s26_s18, 2  ;;  %p206_p2 = scmp.lt.s32.totalorder %s733_s17, 3 }
   0x5   : > { %s922_s18 = smov (%p28_p1, %s26_s18), 0  ;;  %p207_p3 = pnand %p610_p0, %p206_p2 }
   0x6   : > { %p244_p4 = scmp.lt.s32.totalorder (!%p207_p3), %s725_s15, 1 }
   0x7   : > { %210 = sbr.rel (%p207_p3) target bundleno = 375 (0x177), region = 36 }
   0xc   : > { %v275_v0 = vlaneseq  ;;  %s924_s15 = smov (!%p244_p4, %s725_s15), 1  ;;  %v735_v12 = vmov 1.0   ;;  %v736_v38 = vmov 0.0  }
   0xd   : > { %s246_s21 = scalar_lea.vmem %s914_s0, %s924_s15  ;;  %s680_s22 = sshll.u32 %s924_s15, 3 }
   0xe   : > { %v782_v1 = vshrl.u32 %v275_v0, 7  ;;  %v793_v6 = vld [vmem:[%s246_s21] ss:$0 sm:$0xff]  ;;  %s262_s25 = scalar_lea.vmem %s917_s3, %s680_s22  ;;  %s249_s28 = scalar_lea.vmem %s915_s1, %s924_s15 }
   0xf   : > { %v273_v11 = vld [vmem:[%s262_s25] sm:$0xff]  ;;  %s611_s29 = sshll.u32 %s924_s15, 2  ;;  %s266_s9 = scalar_lea.vmem %s918_s4, %s924_s15 }
  0x10   : > { %v291_v2 = vadd.s32 120, %v782_v1  ;;  %v307_v3 = vadd.s32 248, %v782_v1  ;;  %v290_v4 = vadd.s32 112, %v782_v1  ;;  %v306_v5 = vadd.s32 240, %v782_v1  ;;  %441 = vst [vmem:[#allocation1] ss:$2 sm:$0xff] %v273_v11  ;;  %s253_s6 = scalar_lea.vmem %s916_s2, %s611_s29 }
  0x11   : > { %v289_v7 = vadd.s32 104, %v782_v1  ;;  %v305_v8 = vadd.s32 232, %v782_v1  ;;  %v288_v9 = vadd.s32 96, %v782_v1  ;;  %v304_v10 = vadd.s32 224, %v782_v1  ;;  %v710_v44 = vld [vmem:[%s249_s28] ss:$0 sm:$0xff] }
  0x12   : > { %vm358_vm0 = vcmp.eq.s32.totalorder %v291_v2, %v793_v6  ;;  %vm374_vm1 = vcmp.eq.s32.totalorder %v307_v3, %v793_v6  ;;  %vm357_vm2 = vcmp.eq.s32.totalorder %v290_v4, %v793_v6  ;;  %vm373_vm3 = vcmp.eq.s32.totalorder %v306_v5, %v793_v6  ;;  %v493_v45 = vld [vmem:[%s253_s6] sm:$0xf] }
  0x13   : > { %646 = vmatpush.msk.msra.mxu0 %vm358_vm0, %v735_v12  ;;  %662 = vmatpush.msk.msra.mxu1 %vm374_vm1, %v735_v12  ;;  %vm356_vm4 = vcmp.eq.s32.totalorder %v289_v7, %v793_v6  ;;  %vm372_vm5 = vcmp.eq.s32.totalorder %v305_v8, %v793_v6  ;;  %v287_v13 = vadd.s32 88, %v782_v1  ;;  %v303_v14 = vadd.s32 216, %v782_v1 }
  0x14   : > { %vm355_vm6 = vcmp.eq.s32.totalorder %v288_v9, %v793_v6  ;;  %vm371_vm7 = vcmp.eq.s32.totalorder %v304_v10, %v793_v6  ;;  %v286_v15 = vadd.s32 80, %v782_v1  ;;  %v302_v16 = vadd.s32 208, %v782_v1 }
  0x15   : > { %647 = vmatpush.msk.msra.mxu0 %vm357_vm2, %v735_v12  ;;  %663 = vmatpush.msk.msra.mxu1 %vm373_vm3, %v735_v12  ;;  %vm354_vm8 = vcmp.eq.s32.totalorder %v287_v13, %v793_v6  ;;  %vm370_vm9 = vcmp.eq.s32.totalorder %v303_v14, %v793_v6  ;;  %v285_v17 = vadd.s32 72, %v782_v1  ;;  %v301_v18 = vadd.s32 200, %v782_v1 }
  0x16   : > { %vm353_vm10 = vcmp.eq.s32.totalorder %v286_v15, %v793_v6  ;;  %vm369_vm11 = vcmp.eq.s32.totalorder %v302_v16, %v793_v6  ;;  %v284_v19 = vadd.s32 64, %v782_v1  ;;  %v300_v20 = vadd.s32 192, %v782_v1 }
  0x17   : > { %648 = vmatpush.msk.msra.mxu0 %vm356_vm4, %v735_v12  ;;  %664 = vmatpush.msk.msra.mxu1 %vm372_vm5, %v735_v12  ;;  %vm352_vm12 = vcmp.eq.s32.totalorder %v285_v17, %v793_v6  ;;  %vm368_vm13 = vcmp.eq.s32.totalorder %v301_v18, %v793_v6  ;;  %v283_v21 = vadd.s32 56, %v782_v1  ;;  %v299_v22 = vadd.s32 184, %v782_v1  ;;  %v442_v36 = vld.sshfl [vmem:[#allocation1] sm:$0xff pattern:$0x75316420] }
  0x18   : > { %vm351_vm14 = vcmp.eq.s32.totalorder %v284_v19, %v793_v6  ;;  %vm367_vm15 = vcmp.eq.s32.totalorder %v300_v20, %v793_v6  ;;  %v282_v23 = vadd.s32 48, %v782_v1  ;;  %v298_v24 = vadd.s32 176, %v782_v1  ;;  %v443_v37 = vld.sshfl [vmem:[#allocation1 + $0x8] sm:$0xff pattern:$0x75316420] }
  0x19   : > { %649 = vmatpush.msk.msra.mxu0 %vm355_vm6, %v735_v12  ;;  %665 = vmatpush.msk.msra.mxu1 %vm371_vm7, %v735_v12  ;;  %vm350_vm0 = vcmp.eq.s32.totalorder %v283_v21, %v793_v6  ;;  %vm366_vm1 = vcmp.eq.s32.totalorder %v299_v22, %v793_v6  ;;  %v281_v25 = vadd.s32 40, %v782_v1  ;;  %v297_v26 = vadd.s32 168, %v782_v1 }
  0x1a   : > { %vm349_vm2 = vcmp.eq.s32.totalorder %v282_v23, %v793_v6  ;;  %vm365_vm3 = vcmp.eq.s32.totalorder %v298_v24, %v793_v6  ;;  %v280_v27 = vadd.s32 32, %v782_v1  ;;  %v296_v28 = vadd.s32 160, %v782_v1 }
  0x1b   : > { %650 = vmatpush.msk.msra.mxu0 %vm354_vm8, %v735_v12  ;;  %666 = vmatpush.msk.msra.mxu1 %vm370_vm9, %v735_v12  ;;  %vm348_vm4 = vcmp.eq.s32.totalorder %v281_v25, %v793_v6  ;;  %vm364_vm5 = vcmp.eq.s32.totalorder %v297_v26, %v793_v6  ;;  %v279_v29 = vadd.s32 24, %v782_v1  ;;  %v295_v30 = vadd.s32 152, %v782_v1 }
  0x1c   : > { %vm347_vm6 = vcmp.eq.s32.totalorder %v280_v27, %v793_v6  ;;  %vm363_vm7 = vcmp.eq.s32.totalorder %v296_v28, %v793_v6  ;;  %v278_v31 = vadd.s32 16, %v782_v1  ;;  %v294_v32 = vadd.s32 144, %v782_v1 }
  0x1d   : > { %651 = vmatpush.msk.msra.mxu0 %vm353_vm10, %v735_v12  ;;  %667 = vmatpush.msk.msra.mxu1 %vm369_vm11, %v735_v12  ;;  %vm346_vm8 = vcmp.eq.s32.totalorder %v279_v29, %v793_v6  ;;  %vm362_vm9 = vcmp.eq.s32.totalorder %v295_v30, %v793_v6  ;;  %v277_v33 = vadd.s32 8, %v782_v1  ;;  %v293_v34 = vadd.s32 136, %v782_v1 }
  0x1e   : > { %vm345_vm10 = vcmp.eq.s32.totalorder %v278_v31, %v793_v6  ;;  %vm361_vm11 = vcmp.eq.s32.totalorder %v294_v32, %v793_v6  ;;  %v292_v35 = vadd.s32 128, %v782_v1  ;;  %v499_v46 = vmul.f32 %v710_v44, %v493_v45 }
  0x1f   : > { %652 = vmatpush.msk.msra.mxu0 %vm352_vm12, %v735_v12  ;;  %668 = vmatpush.msk.msra.mxu1 %vm368_vm13, %v735_v12  ;;  %vm344_vm12 = vcmp.eq.s32.totalorder %v277_v33, %v793_v6  ;;  %vm360_vm13 = vcmp.eq.s32.totalorder %v293_v34, %v793_v6 }
  0x21   : > { %653 = vmatpush.msk.msra.mxu0 %vm351_vm14, %v735_v12  ;;  %669 = vmatpush.msk.msra.mxu1 %vm367_vm15, %v735_v12  ;;  %vm343_vm14 = vcmp.eq.s32.totalorder %v782_v1, %v793_v6  ;;  %vm359_vm15 = vcmp.eq.s32.totalorder %v292_v35, %v793_v6 }
  0x23   : > { %654 = vmatpush.msk.msra.mxu0 %vm350_vm0, %v735_v12  ;;  %670 = vmatpush.msk.msra.mxu1 %vm366_vm1, %v735_v12  ;;  %vm271_vm0 = vcmask 60416   ;;  %vm513_vm1 = vcmask 0  }
  0x24   : > { %272 = vst.msk [vmem:[#allocation2] sm:$0xf] %vm271_vm0, %v736_v38 }
  0x25   : > { %655 = vmatpush.msk.msra.mxu0 %vm349_vm2, %v735_v12  ;;  %671 = vmatpush.msk.msra.mxu1 %vm365_vm3, %v735_v12 }
  0x27   : > { %656 = vmatpush.msk.msra.mxu0 %vm348_vm4, %v735_v12  ;;  %672 = vmatpush.msk.msra.mxu1 %vm364_vm5, %v735_v12 }
  0x29   : > { %657 = vmatpush.msk.msra.mxu0 %vm347_vm6, %v735_v12  ;;  %673 = vmatpush.msk.msra.mxu1 %vm363_vm7, %v735_v12 }
  0x2b   : > { %658 = vmatpush.msk.msra.mxu0 %vm346_vm8, %v735_v12  ;;  %674 = vmatpush.msk.msra.mxu1 %vm362_vm9, %v735_v12  ;;  %v439_v41 = vld [vmem:[#allocation2] sm:$0xf] }
  0x2d   : > { %659 = vmatpush.msk.msra.mxu0 %vm345_vm10, %v735_v12  ;;  %675 = vmatpush.msk.msra.mxu1 %vm361_vm11, %v735_v12 }
  0x2f   : > { %660 = vmatpush.msk.msra.mxu0 %vm344_vm12, %v735_v12  ;;  %676 = vmatpush.msk.msra.mxu1 %vm360_vm13, %v735_v12 }
  0x31   : > { %661 = vmatpush.msk.msra.mxu0 %vm343_vm14, %v735_v12  ;;  %677 = vmatpush.msk.msra.mxu1 %vm359_vm15, %v735_v12 }
  0x32   : > { %462 = vmatmul.f32.vlgmr.msra.gmra.mxu0 %v442_v36  ;;  %482 = vmatmul.f32.vlgmr.msra.gmra.mxu1 %v443_v37 }
  0xaf   : > { %v463_v39 = vpop.f32.mrf.mxu0  ;;  %v483_v40 = vpop.f32.mrf.mxu1 }
  0xb0   : > { %v484_v42 = vadd.f32 %v483_v40, %v463_v39 }
  0xb2   : > { %v486_v43 = vadd.f32 %v484_v42, %v439_v41 }
  0xb4   : > { %488 = vst.msk [vmem:[#allocation2] sm:$0xf] %vm271_vm0, %v486_v43 }
  0xbb   : > { %v492_v47 = vld [vmem:[#allocation2] sm:$0xf] }
  0xbc   : > { %v498_v48 = vmul.f32 %v710_v44, %v492_v47 }
  0xbe   : > { %v500_v49 = vsub.f32 %v498_v48, %v499_v46 }
  0xc0   : > { %v501_v50 = vand.u32 2147483647, %v500_v49 }
  0xc2   : > { %v502_v51 = vsel %vm271_vm0, %v501_v50, 0.0 }
  0xc3   : > { %503 = vadd.xlane.f32.xlu0 %v502_v51 }
 0x136   : > { %v504_v52 = vpop.xlane.xlu0 %503 }
 0x137   : > { %v505_v53 = vrot.slane %v504_v52, 4 }
 0x139   : > { %v506_v54 = vadd.f32 %v505_v53, %v504_v52 }
 0x13b   : > { %v507_v55 = vrot.slane %v506_v54, 2 }
 0x13d   : > { %v508_v56 = vadd.f32 %v507_v55, %v506_v54 }
 0x13f   : > { %v509_v57 = vrot.slane %v508_v56, 1 }
 0x141   : > { %v510_v58 = vadd.f32 %v509_v57, %v508_v56 }
 0x143   : > { %681 = vpush %v510_v58 }
 0x174   : > { %s682_s10 = spop %681 }
 0x175   : > { %v512_v59 = vstv %s682_s10 }
 0x176   : > { %514 = vst.msk [vmem:[%s266_s9] sm:$0x1] %vm513_vm1, %v512_v59 }
 0x177 PF: > { %s14_s17 = sadd.s32 1, %s733_s17   ;;  %s919_s15 = smov %s729_s16 }
 0x178   : > { %p11_p5 = scmp.ge.s32.totalorder %s14_s17, 4   ;;  %s920_s16 = smov %s922_s18 }
 0x17a   :  { %13 = sbr.rel (!%p11_p5) target bundleno = 2 (0x2), region = 83 }

</bundles_post_ra>
